<compile_context>
chip_gen: v7x
topology: tpu7x:2x2x1
jax: 0.10.0
libtpu: 0.0.40
codegen_flags: <defaults>
</compile_context>

<pallas_src>
import jax
import jax.numpy as jnp
from jax.experimental import pallas as pl
from jax.experimental.pallas import tpu as pltpu


def _logreg_kernel(x_ref, w_ref, b_ref, o_ref):
    # x_ref: [TB, D] VMEM (streamed), w_ref: [1, D] VMEM (resident),
    # b_ref: [1] SMEM scalar, o_ref: [TB, 1].
    x = x_ref[...].astype(jnp.float32)
    w = w_ref[...].astype(jnp.float32)                      # broadcasts over rows (VPU)
    logits = jnp.sum(x * w, axis=-1, keepdims=True)         # XLU row-reduce -> [TB, 1]
    logits = logits + b_ref[0]                              # scalar bias from SMEM
    o_ref[...] = jax.nn.sigmoid(logits).astype(o_ref.dtype)  # EUP exp


def _pick_batch_tile(batch, d, itemsize, target_bytes=2 * 1024 * 1024):
    """~2 MiB of x per block, multiple of 8 sublanes, never larger than batch."""
    tb = (target_bytes // max(1, d * itemsize)) // 8 * 8
    tb = max(8, min(tb, 1024))
    return batch if tb >= batch else tb


def _binary_logistic_regression_pallas(x, weight, bias):
    B, D = x.shape
    w = weight.reshape(1, D)        # keep lane-dense [1, D]; no transpose
    b = bias.reshape(1)

    tb = _pick_batch_tile(B, D, x.dtype.itemsize)
    grid = (pl.cdiv(B, tb),)

    itemsize = x.dtype.itemsize
    cost = pl.CostEstimate(
        flops=2 * B * D,
        transcendentals=B,
        bytes_accessed=(B * D + D + 1 + B) * itemsize,
    )

    return pl.pallas_call(
        _logreg_kernel,
        out_shape=jax.ShapeDtypeStruct((B, 1), x.dtype),
        grid_spec=pltpu.PrefetchScalarGridSpec(
            num_scalar_prefetch=0,
            grid=grid,
            in_specs=[
                # x: streamed batch tiles (double-buffered by Pallas).
                pl.BlockSpec((tb, D), lambda i: (i, 0)),
                # weight: same block every step -> stays resident in VMEM.
                pl.BlockSpec((1, D), lambda i: (0, 0)),
                # bias: whole (tiny) array in SMEM, read as a scalar.
                pl.BlockSpec(memory_space=pltpu.MemorySpace.SMEM),
            ],
            out_specs=pl.BlockSpec((tb, 1), lambda i: (i, 0)),
        ),
        compiler_params=pltpu.CompilerParams(
            # Batch tiles are independent -> megacore-shard on v7x's 2 TCs.
            dimension_semantics=("parallel",),
        ),
        cost_estimate=cost,
    )(x, w, b)


def binary_logistic_regression(x, weight, bias, *, force_pallas=False):
    """x: [B, D], weight: [1, D] (PyTorch nn.Linear layout), bias: [1]."""
    B, D = x.shape
    # For tiny problems XLA's fused sigmoid(x @ W.T + b) beats launch overhead.
    if not force_pallas and B * D * x.dtype.itemsize < 256 * 1024:
        return jax.nn.sigmoid(x @ weight.reshape(1, D).T + bias.reshape(1, 1))
    return _binary_logistic_regression_pallas(x, weight, bias)


if __name__ == "__main__":
    key = jax.random.PRNGKey(0)
    kx, kw, kb = jax.random.split(key, 3)

    batch, input_dim = 8, 32
    x = jax.random.normal(kx, (batch, input_dim), dtype=jnp.float32)

    # Deterministic parameter init mirroring nn.Linear(input_dim, 1):
    # uniform(-1/sqrt(input_dim), 1/sqrt(input_dim)).
    bound = 1.0 / float(input_dim) ** 0.5
    weight = jax.random.uniform(
        kw, (1, input_dim), dtype=jnp.float32, minval=-bound, maxval=bound
    )
    bias = jax.random.uniform(
        kb, (1,), dtype=jnp.float32, minval=-bound, maxval=bound
    )

    # Small-shape check (forces the Pallas path so the kernel runs).
    out = binary_logistic_regression(x, weight, bias, force_pallas=True)
    out = jax.block_until_ready(out)
    ref = jax.nn.sigmoid(x @ weight.T + bias)
    assert out.shape == (batch, 1)
    assert jnp.allclose(out, ref, atol=1e-5, rtol=1e-5)

    # Larger check exercising the multi-tile / ragged-tail pipelined path.
    B2, D2 = 2500, 256
    k2x, k2w, k2b = jax.random.split(jax.random.PRNGKey(1), 3)
    x2 = jax.random.normal(k2x, (B2, D2), dtype=jnp.float32)
    bound2 = 1.0 / float(D2) ** 0.5
    w2 = jax.random.uniform(k2w, (1, D2), jnp.float32, -bound2, bound2)
    b2 = jax.random.uniform(k2b, (1,), jnp.float32, -bound2, bound2)
    out2 = jax.block_until_ready(
        binary_logistic_regression(x2, w2, b2, force_pallas=True)
    )
    ref2 = jax.nn.sigmoid(x2 @ w2.T + b2)
    assert out2.shape == (B2, 1)
    assert jnp.allclose(out2, ref2, atol=1e-5, rtol=1e-5)

    print("KERNEL_OK")
</pallas_src>

<mosaic_0001>
module attributes {stable_mosaic.version = 11 : i64} {
  func.func @_logreg_kernel(%arg0: i32, %arg1: memref<8x32xf32, #tpu.memory_space<vmem>>, %arg2: memref<1x32xf32, #tpu.memory_space<vmem>>, %arg3: memref<1xf32, #tpu.memory_space<smem>>, %arg4: memref<8x1xf32, #tpu.memory_space<vmem>>) attributes {dimension_semantics = [#tpu.dimension_semantics<parallel>], iteration_bounds = array<i64: 1>, scalar_prefetch = 0 : i64, scratch_operands = 0 : i64, tpu.core_type = #tpu.core_type<tc>, window_params = [{transform_indices = @transform_0, window_bounds = array<i64: 8, 32>}, {pipeline_mode = #tpu.pipeline_mode<synchronous>, transform_indices = @transform_1, window_bounds = array<i64: 1, 32>}, {transform_indices = @transform_2, window_bounds = array<i64: 1>}, {transform_indices = @transform_3, window_bounds = array<i64: 8, 1>}]} {
    %c0 = arith.constant 0 : index
    %c0_0 = arith.constant 0 : index
    %0 = vector.load %arg1[%c0, %c0_0] : memref<8x32xf32, #tpu.memory_space<vmem>>, vector<8x32xf32>
    %c0_1 = arith.constant 0 : index
    %c0_2 = arith.constant 0 : index
    %1 = vector.load %arg2[%c0_1, %c0_2] : memref<1x32xf32, #tpu.memory_space<vmem>>, vector<1x32xf32>
    %2 = vector.broadcast %1 : vector<1x32xf32> to vector<8x32xf32>
    %3 = arith.mulf %0, %2 : vector<8x32xf32>
    %cst = arith.constant dense<0.000000e+00> : vector<8xf32>
    %4 = vector.multi_reduction <add>, %3, %cst [1] : vector<8x32xf32> to vector<8xf32>
    %5 = vector.shape_cast %4 : vector<8xf32> to vector<8x1xf32>
    %c0_3 = arith.constant 0 : index
    %6 = memref.load %arg3[%c0_3] : memref<1xf32, #tpu.memory_space<smem>>
    %7 = vector.broadcast %6 : f32 to vector<8x1xf32>
    %8 = arith.addf %5, %7 : vector<8x1xf32>
    %9 = arith.negf %8 : vector<8x1xf32>
    %10 = math.exp %9 : vector<8x1xf32>
    %cst_4 = arith.constant 1.000000e+00 : f32
    %11 = vector.broadcast %cst_4 : f32 to vector<8x1xf32>
    %12 = arith.addf %11, %10 : vector<8x1xf32>
    %13 = arith.divf %11, %12 : vector<8x1xf32>
    %c0_5 = arith.constant 0 : index
    %c0_6 = arith.constant 0 : index
    %14 = vector.load %arg4[%c0_5, %c0_6] : memref<8x1xf32, #tpu.memory_space<vmem>>, vector<8x1xf32>
    tpu.vector_store %arg4[%c0_5, %c0_6], %13 {strides = array<i32>} : memref<8x1xf32, #tpu.memory_space<vmem>>, vector<8x1xf32>,
    return
  }
  func.func @transform_0(%arg0: i32) -> (i32, i32) {
    %c0_i32 = arith.constant 0 : i32
    %c0_i32_0 = arith.constant 0 : i32
    return %arg0, %c0_i32 : i32, i32
  }
  func.func @transform_1(%arg0: i32) -> (i32, i32) {
    %c0_i32 = arith.constant 0 : i32
    %c0_i32_0 = arith.constant 0 : i32
    %c0_i32_1 = arith.constant 0 : i32
    return %c0_i32, %c0_i32_0 : i32, i32
  }
  func.func @transform_2(%arg0: i32) -> i32 {
    %c0_i32 = arith.constant 0 : i32
    %c0_i32_0 = arith.constant 0 : i32
    return %c0_i32 : i32
  }
  func.func @transform_3(%arg0: i32) -> (i32, i32) {
    %c0_i32 = arith.constant 0 : i32
    %c0_i32_0 = arith.constant 0 : i32
    return %arg0, %c0_i32 : i32, i32
  }
}

</mosaic_0001>

<bundles_post_ra>
// kernel: tpu_custom_call.1
= control target key start
LH: loop header
LB: loop body
LE: loop exit
PB: predicated region body
PF: predicated region fallthrough
CT: control target
= control target key end

     0   :  { %9 = vsyncpa [#allocation4], 0  ;;  %s87_s12 = smov [#allocation3]   ;;  %s129_s0 = inlined_call_operand.hbm [shape: f32[8,32], index: 0, kind: input, shape index: {}]   ;;  %s130_s1 = inlined_call_operand.vmem [shape: f32[1,32], index: 1, kind: input, shape index: {}]   ;;  %s131_s2 = inlined_call_operand.<no memory space> [shape: f32[1], index: 2, kind: input, shape index: {}]   ;;  %s132_s3 = inlined_call_operand.vmem [shape: f32[8,1], index: 3, kind: output, shape index: {}]  }
   0x1   :  { %s16_s13 = sshll.u32 %s87_s12, 4  ;;  %s63_s16 = scalar_lea.hbm %s129_s0, 128  ;;  %s17_s13 = int_to_ptr.vmem [resolvable:$true] %s16_s13 }
   0x2   :  { %p64_p0 = scmp.ne.s32.totalorder %s129_s0, %s63_s16  ;;  %p67_p1 = scmp.lt.u32.totalorder %s63_s16, %s129_s0 }
   0x4   :  { %p69_p2 = pnand %p67_p1, %p64_p0 }
   0x6   :  { %72 = shalt.err (!%p69_p2)
}
   0x7   :  { %s73_s21 = scalar_lea.vmem %s17_s13, 128  ;;  %p78_p4 = scmp.lt.s32.totalorder %s17_s13, %s17_s13 }
   0x8   :  { %p74_p3 = scmp.ne.s32.totalorder %s17_s13, %s73_s21  ;;  %p79_p5 = scmp.lt.s32.totalorder %s73_s21, %s73_s21 }
   0xa   :  { %p80_p6 = por %p79_p5, %p78_p4 }
   0xc   :  { %p81_p7 = pnand %p80_p6, %p74_p3 }
   0xe   :  { %84 = shalt.err (!%p81_p7)
}
   0xf   :  { %19 = dma.hbm_to_vmem [thread:$0]  %s129_s0, 128, %s17_s13, [#allocation4]  }
  0x10   :  { %85 = dma.done.wait [#allocation4], 128  }
  0x11   :  { %86 = vsyncadd [#allocation4], 4294967168  ;;  %v27_v0 = vld [vmem:[#allocation3] sm:$0xff]  ;;  %vm36_vm0 = vcmask 261120   ;;  %v41_v4 = vstv %s131_s2  ;;  %vm49_vm1 = vcmask 7168  }
  0x12   :  { %v56_v1 = vld [vmem:[%s130_s1] ss:$0 sm:$0xff] }
  0x13   :  { %v35_v2 = vmul.f32 %v56_v1, %v27_v0 }
  0x15   :  { %v37_v3 = vsel %vm36_vm0, %v35_v2, 0.0 }
  0x16   :  { %38 = vadd.xlane.f32.xlu0 %v37_v3 }
  0xa3   :  { %v39_v5 = vpop.xlane.xlu0 %38 }
  0xa4   :  { %v42_v6 = vadd.f32 %v41_v4, %v39_v5 }
  0xa6   :  { %v57_v7 = vmul.f32 -1.442695, %v42_v6 }
  0xa8   :  { %59 = vpow2.f32 %v57_v7 }
  0xb2   :  { %v60_v8 = vpop.eup %59 }
  0xb3   :  { %v46_v9 = vadd.f32 1.0, %v60_v8 }
  0xb5   :  { %61 = vrcp.f32 %v46_v9 }
  0xbf   :  { %v62_v10 = vpop.eup %61 }
  0xc0   :  { %50 = vst.msk [vmem:[%s132_s3] sm:$0xff] %vm49_vm1, %v62_v10 }
  0xc1   :  { %55 = vsyncpa [#allocation4], 1 }

</bundles_post_ra>
